<compile_context>
chip_gen: v7x
topology: tpu7x:2x2x1
jax: 0.10.0
libtpu: 0.0.40
codegen_flags: <defaults>
</compile_context>

<pallas_src>
import functools

import jax
import jax.numpy as jnp
from jax import lax
from jax.experimental import pallas as pl
from jax.experimental.pallas import tpu as pltpu


# ----------------------------------------------------------------------------
# Fused kernel (single invocation): MLP embedding for all B*M rows + n_layer x
# n_head linear-attention layers with a tiny unrolled per-batch loop.
#   z0_ref    : (B*M, D)  input pre-padded to D lanes; placeholder row folded in
#   rmask_bm  : (B*M, 1)  1.0 on real token rows, 0.0 on the placeholder row
#   rmask_m   : (M, 1)    same mask, per-sequence view
#   qv_ref    : (n_layer, n_head*D, D)  Q heads stacked vertically per layer
#   pt_ref    : (n_layer, n_head, D, D) P^T per layer/head
#   o_ref     : (B, M, D)
# ----------------------------------------------------------------------------
def _fused_kernel(z0_ref, rmask_bm_ref, rmask_m_ref,
                  w1_ref, b1_ref, w2_ref, b2_ref, w3p_ref, b3p_ref,
                  qv_ref, pt_ref, o_ref,
                  *, n_layer, n_head, n_tokens, d, B, M, D):
    f32 = jnp.float32

    # --- embedding MLP, vectorized over all B*M rows ------------------------
    z0 = z0_ref[...]                                        # (B*M, D)
    x = z0[:, :d]                                           # (B*M, d)
    h1 = jnp.maximum(
        jnp.dot(x, w1_ref[...], preferred_element_type=f32) + b1_ref[...], 0.0)
    h2 = jnp.maximum(
        jnp.dot(h1, w2_ref[...], preferred_element_type=f32) + b2_ref[...], 0.0)
    # w3/b3 pre-padded to width D -> lanes [0, d+1) of emb are exactly zero.
    emb = jnp.dot(h2, w3p_ref[...], preferred_element_type=f32) + b3p_ref[...]
    # Select (not multiply) so the unused placeholder-row MLP output can never
    # leak, even if it were non-finite.
    emb = jnp.where(rmask_bm_ref[...] > 0.5, emb, 0.0)
    Z_all = z0 + emb                                        # == cat(Z_in, emb)

    rmask_m = rmask_m_ref[...]                              # (M, 1)
    inv_n = 1.0 / float(n_tokens)

    # --- linear attention layers (reassociated; exact because A = A^T = A^2) -
    Zs = [Z_all[b * M:(b + 1) * M, :] for b in range(B)]
    # TODO(synk): switch the layer loop to lax.fori_loop carrying Z if n_layer
    # grows beyond a handful (keeps code size / vreg pressure flat).
    for i in range(n_layer):
        qv_i = qv_ref[i]                                    # (n_head*D, D)
        for b in range(B):
            Zb = Zs[b]
            Zm = Zb * rmask_m                               # A @ Z (last row 0)
            # G = Z^T A Z == Zm^T Zm, no explicit transpose on the serial chain.
            G = lax.dot_general(Zm, Zm, (((0,), (0,)), ((), ())),
                                preferred_element_type=f32)           # (D, D)
            QG = jnp.dot(qv_i, G, preferred_element_type=f32)  # all heads, 1 push
            W = jnp.zeros((D, D), f32)
            for j in range(n_head):
                W = W + jnp.dot(QG[j * D:(j + 1) * D, :], pt_ref[i, j],
                                preferred_element_type=f32)
            Zs[b] = Zb + jnp.dot(Zb, W * inv_n, preferred_element_type=f32)

    for b in range(B):
        o_ref[b] = Zs[b]
    # NOTE: when scaling, present a lane-dense output (pad D to a multiple of
    # 128 and strip in the wrapper) to avoid masked partial stores.


# ----------------------------------------------------------------------------
# Wrapper: one-time input/parameter massaging + a single fused pallas_call.
# ----------------------------------------------------------------------------
def forward(Z_in, params, n_layer, n_head, hidden_dim):
    B, M, dp1 = Z_in.shape
    d = dp1 - 1
    D = dp1 + hidden_dim
    n_tokens = M - 1
    h3 = params["w1"].shape[1]
    f32 = jnp.float32

    # Input padded from width d+1 to D (zeros); placeholder "ones" row folded in.
    z0 = jnp.pad(Z_in.astype(f32), ((0, 0), (0, 0), (0, D - dp1)))
    z0 = z0.at[:, n_tokens, dp1:].set(1.0)
    z0 = z0.reshape(B * M, D)

    # Row masks (precomputed; no iota/compare inside the kernel).
    rm = (jnp.arange(M) < n_tokens).astype(f32)
    rmask_m = rm.reshape(M, 1)
    rmask_bm = jnp.tile(rm, (B,)).reshape(B * M, 1)

    # Pad the last MLP layer so its output lands directly at lanes [d+1, D).
    w3p = jnp.zeros((h3, D), f32).at[:, dp1:].set(params["w3"])
    b3p = jnp.zeros((1, D), f32).at[:, dp1:].set(params["b3"])

    # Stack Q heads vertically per layer; pre-transpose P once.
    ap = params["allparam"]
    qv = ap[:, :, 1].reshape(n_layer, n_head * D, D)
    pt = jnp.swapaxes(ap[:, :, 0], -1, -2)                  # (n_layer, n_head, D, D)

    args = (z0, rmask_bm, rmask_m,
            params["w1"], params["b1"], params["w2"], params["b2"],
            w3p, b3p, qv, pt)

    kernel = functools.partial(
        _fused_kernel, n_layer=n_layer, n_head=n_head, n_tokens=n_tokens,
        d=d, B=B, M=M, D=D)

    def full_spec(a):
        nd = a.ndim
        return pl.BlockSpec(a.shape, lambda i, _nd=nd: (0,) * _nd)

    return pl.pallas_call(
        kernel,
        out_shape=jax.ShapeDtypeStruct((B, M, D), f32),
        grid_spec=pltpu.PrefetchScalarGridSpec(
            num_scalar_prefetch=0,
            grid=(1,),                       # single step: batch folded in-kernel
            in_specs=[full_spec(a) for a in args],
            out_specs=pl.BlockSpec((B, M, D), lambda i: (0, 0, 0)),
        ),
        compiler_params=pltpu.CompilerParams(
            dimension_semantics=("arbitrary",)),
    )(*args)


# ----------------------------------------------------------------------------
# Pure-JAX reference (original, non-reassociated formulation).
# ----------------------------------------------------------------------------
def reference_forward(Z_in, params, n_layer, n_head, hidden_dim):
    B, _, _ = Z_in.shape
    x = Z_in[:, :-1, :-1]
    h1 = jnp.maximum(x @ params["w1"] + params["b1"], 0.0)
    h2 = jnp.maximum(h1 @ params["w2"] + params["b2"], 0.0)
    emb = h2 @ params["w3"] + params["b3"]
    emb = jnp.concatenate((emb, jnp.ones((B, 1, hidden_dim), jnp.float32)), axis=1)
    Z = jnp.concatenate((Z_in, emb), axis=2)
    M = Z.shape[1]
    N = M - 1
    A = jnp.eye(M).at[N, N].set(0.0)
    for i in range(n_layer):
        Zi = Z
        residues = 0.0
        for j in range(n_head):
            P = params["allparam"][i, j, 0]
            Q = params["allparam"][i, j, 1]
            attn = jnp.einsum("BNi,ij,BMj->BNM", Zi, Q, Zi)
            key = jnp.einsum("ij,BNj->BNi", P, Zi)
            residues = residues + jnp.einsum("BNM,ML,BLi->BNi", attn, A, key) / N
        Z = Zi + residues
    return Z


if __name__ == "__main__":
    # Small shapes consistent with the module.
    n_layer, n_head = 2, 2
    d, hidden_dim = 4, 8
    N = 8                      # number of "real" tokens; sequence length = N + 1
    B = 2
    var = 0.1
    D = d + 1 + hidden_dim     # feature dim after concatenating the embedding

    key = jax.random.PRNGKey(0)
    k_ap, k_w1, k_b1, k_w2, k_b2, k_w3, k_b3, k_z = jax.random.split(key, 8)

    # allparam ~ N(0, var)  (torch normal_(0, var) uses var as the std).
    allparam = var * jax.random.normal(
        k_ap, (n_layer, n_head, 2, D, D), jnp.float32)

    # Deterministic init for the embed MLP (synthetic; mimics fan-in scaling).
    def lin_init(kw, kb, fan_in, fan_out):
        bound = 1.0 / jnp.sqrt(jnp.float32(fan_in))
        w = jax.random.uniform(kw, (fan_in, fan_out), jnp.float32, -bound, bound)
        b = jax.random.uniform(kb, (1, fan_out), jnp.float32, -bound, bound)
        return w, b

    w1, b1 = lin_init(k_w1, k_b1, d, hidden_dim * 3)
    w2, b2 = lin_init(k_w2, k_b2, hidden_dim * 3, hidden_dim * 3)
    w3, b3 = lin_init(k_w3, k_b3, hidden_dim * 3, hidden_dim)

    params = dict(allparam=allparam, w1=w1, b1=b1, w2=w2, b2=b2, w3=w3, b3=b3)

    # Input Z: (B, N+1, d+1)
    Z_in = jax.random.normal(k_z, (B, N + 1, d + 1), jnp.float32)

    fwd = jax.jit(functools.partial(
        forward, n_layer=n_layer, n_head=n_head, hidden_dim=hidden_dim))
    out = jax.block_until_ready(fwd(Z_in, params))

    ref = reference_forward(Z_in, params, n_layer, n_head, hidden_dim)
    assert out.shape == (B, N + 1, D)
    # Reassociated attention is algebraically exact; fp summation order changes
    # slightly, hence the 1e-3 tolerance.
    assert jnp.allclose(out, ref, atol=1e-3, rtol=1e-3), "mismatch vs reference"

    print("KERNEL_OK")
</pallas_src>

<mosaic_0001>
module attributes {stable_mosaic.version = 11 : i64} {
  func.func @_fused_kernel(%arg0: i32, %arg1: memref<18x13xf32, #tpu.memory_space<vmem>>, %arg2: memref<18x1xf32, #tpu.memory_space<vmem>>, %arg3: memref<9x1xf32, #tpu.memory_space<vmem>>, %arg4: memref<4x24xf32, #tpu.memory_space<vmem>>, %arg5: memref<1x24xf32, #tpu.memory_space<vmem>>, %arg6: memref<24x24xf32, #tpu.memory_space<vmem>>, %arg7: memref<1x24xf32, #tpu.memory_space<vmem>>, %arg8: memref<24x13xf32, #tpu.memory_space<vmem>>, %arg9: memref<1x13xf32, #tpu.memory_space<vmem>>, %arg10: memref<2x26x13xf32, #tpu.memory_space<vmem>>, %arg11: memref<2x2x13x13xf32, #tpu.memory_space<vmem>>, %arg12: memref<2x9x13xf32, #tpu.memory_space<vmem>>) attributes {dimension_semantics = [#tpu.dimension_semantics<arbitrary>], iteration_bounds = array<i64: 1>, scalar_prefetch = 0 : i64, scratch_operands = 0 : i64, tpu.core_type = #tpu.core_type<tc>, window_params = [{pipeline_mode = #tpu.pipeline_mode<synchronous>, transform_indices = @transform_0, window_bounds = array<i64: 18, 13>}, {pipeline_mode = #tpu.pipeline_mode<synchronous>, transform_indices = @transform_1, window_bounds = array<i64: 18, 1>}, {pipeline_mode = #tpu.pipeline_mode<synchronous>, transform_indices = @transform_2, window_bounds = array<i64: 9, 1>}, {pipeline_mode = #tpu.pipeline_mode<synchronous>, transform_indices = @transform_3, window_bounds = array<i64: 4, 24>}, {pipeline_mode = #tpu.pipeline_mode<synchronous>, transform_indices = @transform_4, window_bounds = array<i64: 1, 24>}, {pipeline_mode = #tpu.pipeline_mode<synchronous>, transform_indices = @transform_5, window_bounds = array<i64: 24, 24>}, {pipeline_mode = #tpu.pipeline_mode<synchronous>, transform_indices = @transform_6, window_bounds = array<i64: 1, 24>}, {pipeline_mode = #tpu.pipeline_mode<synchronous>, transform_indices = @transform_7, window_bounds = array<i64: 24, 13>}, {pipeline_mode = #tpu.pipeline_mode<synchronous>, transform_indices = @transform_8, window_bounds = array<i64: 1, 13>}, {pipeline_mode = #tpu.pipeline_mode<synchronous>, transform_indices = @transform_9, window_bounds = array<i64: 2, 26, 13>}, {pipeline_mode = #tpu.pipeline_mode<synchronous>, transform_indices = @transform_10, window_bounds = array<i64: 2, 2, 13, 13>}, {pipeline_mode = #tpu.pipeline_mode<synchronous>, transform_indices = @transform_11, window_bounds = array<i64: 2, 9, 13>}]} {
    %c0 = arith.constant 0 : index
    %c0_0 = arith.constant 0 : index
    %0 = vector.load %arg1[%c0, %c0_0] : memref<18x13xf32, #tpu.memory_space<vmem>>, vector<18x13xf32>
    %1 = vector.extract_strided_slice %0 {offsets = [0, 0], sizes = [18, 4], strides = [1, 1]} : vector<18x13xf32> to vector<18x4xf32>
    %c0_1 = arith.constant 0 : index
    %c0_2 = arith.constant 0 : index
    %2 = vector.load %arg4[%c0_1, %c0_2] : memref<4x24xf32, #tpu.memory_space<vmem>>, vector<4x24xf32>
    %cst = arith.constant dense<0.000000e+00> : vector<18x24xf32>
    %3 = tpu.matmul %1, %2, %cst {dimension_numbers = #tpu.dot_dimension_numbers<[1], [0], [0], [1], [0, 0, 1, 1], [], []>} : vector<18x4xf32>, vector<4x24xf32>, vector<18x24xf32> -> vector<18x24xf32>
    %c0_3 = arith.constant 0 : index
    %c0_4 = arith.constant 0 : index
    %4 = vector.load %arg5[%c0_3, %c0_4] : memref<1x24xf32, #tpu.memory_space<vmem>>, vector<1x24xf32>
    %5 = vector.broadcast %4 : vector<1x24xf32> to vector<18x24xf32>
    %6 = arith.addf %3, %5 : vector<18x24xf32>
    %cst_5 = arith.constant 0.000000e+00 : f32
    %7 = vector.broadcast %cst_5 : f32 to vector<18x24xf32>
    %8 = arith.maximumf %6, %7 : vector<18x24xf32>
    %c0_6 = arith.constant 0 : index
    %c0_7 = arith.constant 0 : index
    %9 = vector.load %arg6[%c0_6, %c0_7] : memref<24x24xf32, #tpu.memory_space<vmem>>, vector<24x24xf32>
    %cst_8 = arith.constant dense<0.000000e+00> : vector<18x24xf32>
    %10 = tpu.matmul %8, %9, %cst_8 {dimension_numbers = #tpu.dot_dimension_numbers<[1], [0], [0], [1], [0, 0, 1, 1], [], []>} : vector<18x24xf32>, vector<24x24xf32>, vector<18x24xf32> -> vector<18x24xf32>
    %c0_9 = arith.constant 0 : index
    %c0_10 = arith.constant 0 : index
    %11 = vector.load %arg7[%c0_9, %c0_10] : memref<1x24xf32, #tpu.memory_space<vmem>>, vector<1x24xf32>
    %12 = vector.broadcast %11 : vector<1x24xf32> to vector<18x24xf32>
    %13 = arith.addf %10, %12 : vector<18x24xf32>
    %cst_11 = arith.constant 0.000000e+00 : f32
    %14 = vector.broadcast %cst_11 : f32 to vector<18x24xf32>
    %15 = arith.maximumf %13, %14 : vector<18x24xf32>
    %c0_12 = arith.constant 0 : index
    %c0_13 = arith.constant 0 : index
    %16 = vector.load %arg8[%c0_12, %c0_13] : memref<24x13xf32, #tpu.memory_space<vmem>>, vector<24x13xf32>
    %cst_14 = arith.constant dense<0.000000e+00> : vector<18x13xf32>
    %17 = tpu.matmul %15, %16, %cst_14 {dimension_numbers = #tpu.dot_dimension_numbers<[1], [0], [0], [1], [0, 0, 1, 1], [], []>} : vector<18x24xf32>, vector<24x13xf32>, vector<18x13xf32> -> vector<18x13xf32>
    %c0_15 = arith.constant 0 : index
    %c0_16 = arith.constant 0 : index
    %18 = vector.load %arg9[%c0_15, %c0_16] : memref<1x13xf32, #tpu.memory_space<vmem>>, vector<1x13xf32>
    %19 = vector.broadcast %18 : vector<1x13xf32> to vector<18x13xf32>
    %20 = arith.addf %17, %19 : vector<18x13xf32>
    %c0_17 = arith.constant 0 : index
    %c0_18 = arith.constant 0 : index
    %21 = vector.load %arg2[%c0_17, %c0_18] : memref<18x1xf32, #tpu.memory_space<vmem>>, vector<18x1xf32>
    %cst_19 = arith.constant 5.000000e-01 : f32
    %22 = vector.broadcast %cst_19 : f32 to vector<18x1xf32>
    %23 = arith.cmpf ogt, %21, %22 : vector<18x1xf32>
    %cst_20 = arith.constant 0.000000e+00 : f32
    %24 = vector.shape_cast %23 : vector<18x1xi1> to vector<18x1xi1>
    %25 = vector.broadcast %24 : vector<18x1xi1> to vector<18x13xi1>
    %26 = vector.broadcast %cst_20 : f32 to vector<18x13xf32>
    %27 = arith.select %25, %20, %26 : vector<18x13xi1>, vector<18x13xf32>
    %28 = arith.addf %0, %27 : vector<18x13xf32>
    %c0_21 = arith.constant 0 : index
    %c0_22 = arith.constant 0 : index
    %29 = vector.load %arg3[%c0_21, %c0_22] : memref<9x1xf32, #tpu.memory_space<vmem>>, vector<9x1xf32>
    %30 = vector.extract_strided_slice %28 {offsets = [0, 0], sizes = [9, 13], strides = [1, 1]} : vector<18x13xf32> to vector<9x13xf32>
    %31 = vector.extract_strided_slice %28 {offsets = [9, 0], sizes = [9, 13], strides = [1, 1]} : vector<18x13xf32> to vector<9x13xf32>
    %c0_23 = arith.constant 0 : index
    %c0_24 = arith.constant 0 : index
    %c0_25 = arith.constant 0 : index
    %32 = vector.load %arg10[%c0_23, %c0_24, %c0_25] : memref<2x26x13xf32, #tpu.memory_space<vmem>>, vector<1x26x13xf32>
    %33 = vector.shape_cast %32 : vector<1x26x13xf32> to vector<26x13xf32>
    %34 = vector.broadcast %29 : vector<9x1xf32> to vector<9x13xf32>
    %35 = arith.mulf %30, %34 : vector<9x13xf32>
    %cst_26 = arith.constant dense<0.000000e+00> : vector<13x13xf32>
    %36 = tpu.matmul %35, %35, %cst_26 {dimension_numbers = #tpu.dot_dimension_numbers<[0], [0], [1], [1], [0, 1, 1, 1], [], []>} : vector<9x13xf32>, vector<9x13xf32>, vector<13x13xf32> -> vector<13x13xf32>
    %cst_27 = arith.constant dense<0.000000e+00> : vector<26x13xf32>
    %37 = tpu.matmul %33, %36, %cst_27 {dimension_numbers = #tpu.dot_dimension_numbers<[1], [0], [0], [1], [0, 0, 1, 1], [], []>} : vector<26x13xf32>, vector<13x13xf32>, vector<26x13xf32> -> vector<26x13xf32>
    %cst_28 = arith.constant 0.000000e+00 : f32
    %38 = vector.broadcast %cst_28 : f32 to vector<13x13xf32>
    %39 = vector.extract_strided_slice %37 {offsets = [0, 0], sizes = [13, 13], strides = [1, 1]} : vector<26x13xf32> to vector<13x13xf32>
    %c0_29 = arith.constant 0 : index
    %c0_30 = arith.constant 0 : index
    %c0_31 = arith.constant 0 : index
    %c0_32 = arith.constant 0 : index
    %40 = vector.load %arg11[%c0_29, %c0_30, %c0_31, %c0_32] : memref<2x2x13x13xf32, #tpu.memory_space<vmem>>, vector<1x1x13x13xf32>
    %41 = vector.shape_cast %40 : vector<1x1x13x13xf32> to vector<13x13xf32>
    %cst_33 = arith.constant dense<0.000000e+00> : vector<13x13xf32>
    %42 = tpu.matmul %39, %41, %cst_33 {dimension_numbers = #tpu.dot_dimension_numbers<[1], [0], [0], [1], [0, 0, 1, 1], [], []>} : vector<13x13xf32>, vector<13x13xf32>, vector<13x13xf32> -> vector<13x13xf32>
    %43 = arith.addf %38, %42 : vector<13x13xf32>
    %44 = vector.extract_strided_slice %37 {offsets = [13, 0], sizes = [13, 13], strides = [1, 1]} : vector<26x13xf32> to vector<13x13xf32>
    %c0_34 = arith.constant 0 : index
    %c1 = arith.constant 1 : index
    %c0_35 = arith.constant 0 : index
    %c0_36 = arith.constant 0 : index
    %45 = vector.load %arg11[%c0_34, %c1, %c0_35, %c0_36] : memref<2x2x13x13xf32, #tpu.memory_space<vmem>>, vector<1x1x13x13xf32>
    %46 = vector.shape_cast %45 : vector<1x1x13x13xf32> to vector<13x13xf32>
    %cst_37 = arith.constant dense<0.000000e+00> : vector<13x13xf32>
    %47 = tpu.matmul %44, %46, %cst_37 {dimension_numbers = #tpu.dot_dimension_numbers<[1], [0], [0], [1], [0, 0, 1, 1], [], []>} : vector<13x13xf32>, vector<13x13xf32>, vector<13x13xf32> -> vector<13x13xf32>
    %48 = arith.addf %43, %47 : vector<13x13xf32>
    %cst_38 = arith.constant 1.250000e-01 : f32
    %49 = vector.broadcast %cst_38 : f32 to vector<13x13xf32>
    %50 = arith.mulf %48, %49 : vector<13x13xf32>
    %cst_39 = arith.constant dense<0.000000e+00> : vector<9x13xf32>
    %51 = tpu.matmul %30, %50, %cst_39 {dimension_numbers = #tpu.dot_dimension_numbers<[1], [0], [0], [1], [0, 0, 1, 1], [], []>} : vector<9x13xf32>, vector<13x13xf32>, vector<9x13xf32> -> vector<9x13xf32>
    %52 = arith.addf %30, %51 : vector<9x13xf32>
    %53 = vector.broadcast %29 : vector<9x1xf32> to vector<9x13xf32>
    %54 = arith.mulf %31, %53 : vector<9x13xf32>
    %cst_40 = arith.constant dense<0.000000e+00> : vector<13x13xf32>
    %55 = tpu.matmul %54, %54, %cst_40 {dimension_numbers = #tpu.dot_dimension_numbers<[0], [0], [1], [1], [0, 1, 1, 1], [], []>} : vector<9x13xf32>, vector<9x13xf32>, vector<13x13xf32> -> vector<13x13xf32>
    %cst_41 = arith.constant dense<0.000000e+00> : vector<26x13xf32>
    %56 = tpu.matmul %33, %55, %cst_41 {dimension_numbers = #tpu.dot_dimension_numbers<[1], [0], [0], [1], [0, 0, 1, 1], [], []>} : vector<26x13xf32>, vector<13x13xf32>, vector<26x13xf32> -> vector<26x13xf32>
    %cst_42 = arith.constant 0.000000e+00 : f32
    %57 = vector.broadcast %cst_42 : f32 to vector<13x13xf32>
    %58 = vector.extract_strided_slice %56 {offsets = [0, 0], sizes = [13, 13], strides = [1, 1]} : vector<26x13xf32> to vector<13x13xf32>
    %c0_43 = arith.constant 0 : index
    %c0_44 = arith.constant 0 : index
    %c0_45 = arith.constant 0 : index
    %c0_46 = arith.constant 0 : index
    %59 = vector.load %arg11[%c0_43, %c0_44, %c0_45, %c0_46] : memref<2x2x13x13xf32, #tpu.memory_space<vmem>>, vector<1x1x13x13xf32>
    %60 = vector.shape_cast %59 : vector<1x1x13x13xf32> to vector<13x13xf32>
    %cst_47 = arith.constant dense<0.000000e+00> : vector<13x13xf32>
    %61 = tpu.matmul %58, %60, %cst_47 {dimension_numbers = #tpu.dot_dimension_numbers<[1], [0], [0], [1], [0, 0, 1, 1], [], []>} : vector<13x13xf32>, vector<13x13xf32>, vector<13x13xf32> -> vector<13x13xf32>
    %62 = arith.addf %57, %61 : vector<13x13xf32>
    %63 = vector.extract_strided_slice %56 {offsets = [13, 0], sizes = [13, 13], strides = [1, 1]} : vector<26x13xf32> to vector<13x13xf32>
    %c0_48 = arith.constant 0 : index
    %c1_49 = arith.constant 1 : index
    %c0_50 = arith.constant 0 : index
    %c0_51 = arith.constant 0 : index
    %64 = vector.load %arg11[%c0_48, %c1_49, %c0_50, %c0_51] : memref<2x2x13x13xf32, #tpu.memory_space<vmem>>, vector<1x1x13x13xf32>
    %65 = vector.shape_cast %64 : vector<1x1x13x13xf32> to vector<13x13xf32>
    %cst_52 = arith.constant dense<0.000000e+00> : vector<13x13xf32>
    %66 = tpu.matmul %63, %65, %cst_52 {dimension_numbers = #tpu.dot_dimension_numbers<[1], [0], [0], [1], [0, 0, 1, 1], [], []>} : vector<13x13xf32>, vector<13x13xf32>, vector<13x13xf32> -> vector<13x13xf32>
    %67 = arith.addf %62, %66 : vector<13x13xf32>
    %cst_53 = arith.constant 1.250000e-01 : f32
    %68 = vector.broadcast %cst_53 : f32 to vector<13x13xf32>
    %69 = arith.mulf %67, %68 : vector<13x13xf32>
    %cst_54 = arith.constant dense<0.000000e+00> : vector<9x13xf32>
    %70 = tpu.matmul %31, %69, %cst_54 {dimension_numbers = #tpu.dot_dimension_numbers<[1], [0], [0], [1], [0, 0, 1, 1], [], []>} : vector<9x13xf32>, vector<13x13xf32>, vector<9x13xf32> -> vector<9x13xf32>
    %71 = arith.addf %31, %70 : vector<9x13xf32>
    %c1_55 = arith.constant 1 : index
    %c0_56 = arith.constant 0 : index
    %c0_57 = arith.constant 0 : index
    %72 = vector.load %arg10[%c1_55, %c0_56, %c0_57] : memref<2x26x13xf32, #tpu.memory_space<vmem>>, vector<1x26x13xf32>
    %73 = vector.shape_cast %72 : vector<1x26x13xf32> to vector<26x13xf32>
    %74 = vector.broadcast %29 : vector<9x1xf32> to vector<9x13xf32>
    %75 = arith.mulf %52, %74 : vector<9x13xf32>
    %cst_58 = arith.constant dense<0.000000e+00> : vector<13x13xf32>
    %76 = tpu.matmul %75, %75, %cst_58 {dimension_numbers = #tpu.dot_dimension_numbers<[0], [0], [1], [1], [0, 1, 1, 1], [], []>} : vector<9x13xf32>, vector<9x13xf32>, vector<13x13xf32> -> vector<13x13xf32>
    %cst_59 = arith.constant dense<0.000000e+00> : vector<26x13xf32>
    %77 = tpu.matmul %73, %76, %cst_59 {dimension_numbers = #tpu.dot_dimension_numbers<[1], [0], [0], [1], [0, 0, 1, 1], [], []>} : vector<26x13xf32>, vector<13x13xf32>, vector<26x13xf32> -> vector<26x13xf32>
    %cst_60 = arith.constant 0.000000e+00 : f32
    %78 = vector.broadcast %cst_60 : f32 to vector<13x13xf32>
    %79 = vector.extract_strided_slice %77 {offsets = [0, 0], sizes = [13, 13], strides = [1, 1]} : vector<26x13xf32> to vector<13x13xf32>
    %c1_61 = arith.constant 1 : index
    %c0_62 = arith.constant 0 : index
    %c0_63 = arith.constant 0 : index
    %c0_64 = arith.constant 0 : index
    %80 = vector.load %arg11[%c1_61, %c0_62, %c0_63, %c0_64] : memref<2x2x13x13xf32, #tpu.memory_space<vmem>>, vector<1x1x13x13xf32>
    %81 = vector.shape_cast %80 : vector<1x1x13x13xf32> to vector<13x13xf32>
    %cst_65 = arith.constant dense<0.000000e+00> : vector<13x13xf32>
    %82 = tpu.matmul %79, %81, %cst_65 {dimension_numbers = #tpu.dot_dimension_numbers<[1], [0], [0], [1], [0, 0, 1, 1], [], []>} : vector<13x13xf32>, vector<13x13xf32>, vector<13x13xf32> -> vector<13x13xf32>
    %83 = arith.addf %78, %82 : vector<13x13xf32>
    %84 = vector.extract_strided_slice %77 {offsets = [13, 0], sizes = [13, 13], strides = [1, 1]} : vector<26x13xf32> to vector<13x13xf32>
    %c1_66 = arith.constant 1 : index
    %c1_67 = arith.constant 1 : index
    %c0_68 = arith.constant 0 : index
    %c0_69 = arith.constant 0 : index
    %85 = vector.load %arg11[%c1_66, %c1_67, %c0_68, %c0_69] : memref<2x2x13x13xf32, #tpu.memory_space<vmem>>, vector<1x1x13x13xf32>
    %86 = vector.shape_cast %85 : vector<1x1x13x13xf32> to vector<13x13xf32>
    %cst_70 = arith.constant dense<0.000000e+00> : vector<13x13xf32>
    %87 = tpu.matmul %84, %86, %cst_70 {dimension_numbers = #tpu.dot_dimension_numbers<[1], [0], [0], [1], [0, 0, 1, 1], [], []>} : vector<13x13xf32>, vector<13x13xf32>, vector<13x13xf32> -> vector<13x13xf32>
    %88 = arith.addf %83, %87 : vector<13x13xf32>
    %cst_71 = arith.constant 1.250000e-01 : f32
    %89 = vector.broadcast %cst_71 : f32 to vector<13x13xf32>
    %90 = arith.mulf %88, %89 : vector<13x13xf32>
    %cst_72 = arith.constant dense<0.000000e+00> : vector<9x13xf32>
    %91 = tpu.matmul %52, %90, %cst_72 {dimension_numbers = #tpu.dot_dimension_numbers<[1], [0], [0], [1], [0, 0, 1, 1], [], []>} : vector<9x13xf32>, vector<13x13xf32>, vector<9x13xf32> -> vector<9x13xf32>
    %92 = arith.addf %52, %91 : vector<9x13xf32>
    %93 = vector.broadcast %29 : vector<9x1xf32> to vector<9x13xf32>
    %94 = arith.mulf %71, %93 : vector<9x13xf32>
    %cst_73 = arith.constant dense<0.000000e+00> : vector<13x13xf32>
    %95 = tpu.matmul %94, %94, %cst_73 {dimension_numbers = #tpu.dot_dimension_numbers<[0], [0], [1], [1], [0, 1, 1, 1], [], []>} : vector<9x13xf32>, vector<9x13xf32>, vector<13x13xf32> -> vector<13x13xf32>
    %cst_74 = arith.constant dense<0.000000e+00> : vector<26x13xf32>
    %96 = tpu.matmul %73, %95, %cst_74 {dimension_numbers = #tpu.dot_dimension_numbers<[1], [0], [0], [1], [0, 0, 1, 1], [], []>} : vector<26x13xf32>, vector<13x13xf32>, vector<26x13xf32> -> vector<26x13xf32>
    %cst_75 = arith.constant 0.000000e+00 : f32
    %97 = vector.broadcast %cst_75 : f32 to vector<13x13xf32>
    %98 = vector.extract_strided_slice %96 {offsets = [0, 0], sizes = [13, 13], strides = [1, 1]} : vector<26x13xf32> to vector<13x13xf32>
    %c1_76 = arith.constant 1 : index
    %c0_77 = arith.constant 0 : index
    %c0_78 = arith.constant 0 : index
    %c0_79 = arith.constant 0 : index
    %99 = vector.load %arg11[%c1_76, %c0_77, %c0_78, %c0_79] : memref<2x2x13x13xf32, #tpu.memory_space<vmem>>, vector<1x1x13x13xf32>
    %100 = vector.shape_cast %99 : vector<1x1x13x13xf32> to vector<13x13xf32>
    %cst_80 = arith.constant dense<0.000000e+00> : vector<13x13xf32>
    %101 = tpu.matmul %98, %100, %cst_80 {dimension_numbers = #tpu.dot_dimension_numbers<[1], [0], [0], [1], [0, 0, 1, 1], [], []>} : vector<13x13xf32>, vector<13x13xf32>, vector<13x13xf32> -> vector<13x13xf32>
    %102 = arith.addf %97, %101 : vector<13x13xf32>
    %103 = vector.extract_strided_slice %96 {offsets = [13, 0], sizes = [13, 13], strides = [1, 1]} : vector<26x13xf32> to vector<13x13xf32>
    %c1_81 = arith.constant 1 : index
    %c1_82 = arith.constant 1 : index
    %c0_83 = arith.constant 0 : index
    %c0_84 = arith.constant 0 : index
    %104 = vector.load %arg11[%c1_81, %c1_82, %c0_83, %c0_84] : memref<2x2x13x13xf32, #tpu.memory_space<vmem>>, vector<1x1x13x13xf32>
    %105 = vector.shape_cast %104 : vector<1x1x13x13xf32> to vector<13x13xf32>
    %cst_85 = arith.constant dense<0.000000e+00> : vector<13x13xf32>
    %106 = tpu.matmul %103, %105, %cst_85 {dimension_numbers = #tpu.dot_dimension_numbers<[1], [0], [0], [1], [0, 0, 1, 1], [], []>} : vector<13x13xf32>, vector<13x13xf32>, vector<13x13xf32> -> vector<13x13xf32>
    %107 = arith.addf %102, %106 : vector<13x13xf32>
    %cst_86 = arith.constant 1.250000e-01 : f32
    %108 = vector.broadcast %cst_86 : f32 to vector<13x13xf32>
    %109 = arith.mulf %107, %108 : vector<13x13xf32>
    %cst_87 = arith.constant dense<0.000000e+00> : vector<9x13xf32>
    %110 = tpu.matmul %71, %109, %cst_87 {dimension_numbers = #tpu.dot_dimension_numbers<[1], [0], [0], [1], [0, 0, 1, 1], [], []>} : vector<9x13xf32>, vector<13x13xf32>, vector<9x13xf32> -> vector<9x13xf32>
    %111 = arith.addf %71, %110 : vector<9x13xf32>
    %c0_88 = arith.constant 0 : index
    %c0_89 = arith.constant 0 : index
    %c0_90 = arith.constant 0 : index
    %112 = vector.load %arg12[%c0_88, %c0_89, %c0_90] : memref<2x9x13xf32, #tpu.memory_space<vmem>>, vector<1x9x13xf32>
    %113 = vector.shape_cast %112 : vector<1x9x13xf32> to vector<9x13xf32>
    %114 = vector.shape_cast %92 : vector<9x13xf32> to vector<1x9x13xf32>
    tpu.vector_store %arg12[%c0_88, %c0_89, %c0_90], %114 {strides = array<i32>} : memref<2x9x13xf32, #tpu.memory_space<vmem>>, vector<1x9x13xf32>,
    %c1_91 = arith.constant 1 : index
    %c0_92 = arith.constant 0 : index
    %c0_93 = arith.constant 0 : index
    %115 = vector.load %arg12[%c1_91, %c0_92, %c0_93] : memref<2x9x13xf32, #tpu.memory_space<vmem>>, vector<1x9x13xf32>
    %116 = vector.shape_cast %115 : vector<1x9x13xf32> to vector<9x13xf32>
    %117 = vector.shape_cast %111 : vector<9x13xf32> to vector<1x9x13xf32>
    tpu.vector_store %arg12[%c1_91, %c0_92, %c0_93], %117 {strides = array<i32>} : memref<2x9x13xf32, #tpu.memory_space<vmem>>, vector<1x9x13xf32>,
    return
  }
  func.func @transform_0(%arg0: i32) -> (i32, i32) {
    %c0_i32 = arith.constant 0 : i32
    %c0_i32_0 = arith.constant 0 : i32
    %c0_i32_1 = arith.constant 0 : i32
    return %c0_i32, %c0_i32_0 : i32, i32
  }
  func.func @transform_1(%arg0: i32) -> (i32, i32) {
    %c0_i32 = arith.constant 0 : i32
    %c0_i32_0 = arith.constant 0 : i32
    %c0_i32_1 = arith.constant 0 : i32
    return %c0_i32, %c0_i32_0 : i32, i32
  }
  func.func @transform_2(%arg0: i32) -> (i32, i32) {
    %c0_i32 = arith.constant 0 : i32
    %c0_i32_0 = arith.constant 0 : i32
    %c0_i32_1 = arith.constant 0 : i32
    return %c0_i32, %c0_i32_0 : i32, i32
  }
  func.func @transform_3(%arg0: i32) -> (i32, i32) {
    %c0_i32 = arith.constant 0 : i32
    %c0_i32_0 = arith.constant 0 : i32
    %c0_i32_1 = arith.constant 0 : i32
    return %c0_i32, %c0_i32_0 : i32, i32
  }
  func.func @transform_4(%arg0: i32) -> (i32, i32) {
    %c0_i32 = arith.constant 0 : i32
    %c0_i32_0 = arith.constant 0 : i32
    %c0_i32_1 = arith.constant 0 : i32
    return %c0_i32, %c0_i32_0 : i32, i32
  }
  func.func @transform_5(%arg0: i32) -> (i32, i32) {
    %c0_i32 = arith.constant 0 : i32
    %c0_i32_0 = arith.constant 0 : i32
    %c0_i32_1 = arith.constant 0 : i32
    return %c0_i32, %c0_i32_0 : i32, i32
  }
  func.func @transform_6(%arg0: i32) -> (i32, i32) {
    %c0_i32 = arith.constant 0 : i32
    %c0_i32_0 = arith.constant 0 : i32
    %c0_i32_1 = arith.constant 0 : i32
    return %c0_i32, %c0_i32_0 : i32, i32
  }
  func.func @transform_7(%arg0: i32) -> (i32, i32) {
    %c0_i32 = arith.constant 0 : i32
    %c0_i32_0 = arith.constant 0 : i32
    %c0_i32_1 = arith.constant 0 : i32
    return %c0_i32, %c0_i32_0 : i32, i32
  }
  func.func @transform_8(%arg0: i32) -> (i32, i32) {
    %c0_i32 = arith.constant 0 : i32
    %c0_i32_0 = arith.constant 0 : i32
    %c0_i32_1 = arith.constant 0 : i32
    return %c0_i32, %c0_i32_0 : i32, i32
  }
  func.func @transform_9(%arg0: i32) -> (i32, i32, i32) {
    %c0_i32 = arith.constant 0 : i32
    %c0_i32_0 = arith.constant 0 : i32
    %c0_i32_1 = arith.constant 0 : i32
    %c0_i32_2 = arith.constant 0 : i32
    return %c0_i32, %c0_i32_0, %c0_i32_1 : i32, i32, i32
  }
  func.func @transform_10(%arg0: i32) -> (i32, i32, i32, i32) {
    %c0_i32 = arith.constant 0 : i32
    %c0_i32_0 = arith.constant 0 : i32
    %c0_i32_1 = arith.constant 0 : i32
    %c0_i32_2 = arith.constant 0 : i32
    %c0_i32_3 = arith.constant 0 : i32
    return %c0_i32, %c0_i32_0, %c0_i32_1, %c0_i32_2 : i32, i32, i32, i32
  }
  func.func @transform_11(%arg0: i32) -> (i32, i32, i32) {
    %c0_i32 = arith.constant 0 : i32
    %c0_i32_0 = arith.constant 0 : i32
    %c0_i32_1 = arith.constant 0 : i32
    %c0_i32_2 = arith.constant 0 : i32
    return %c0_i32, %c0_i32_0, %c0_i32_1 : i32, i32, i32
  }
}

</mosaic_0001>

<bundles_post_ra>
// kernel: tile.8
= control target key start
LH: loop header
LB: loop body
LE: loop exit
PB: predicated region body
PF: predicated region fallthrough
CT: control target
= control target key end

     0   :  { %s22_s0 = inlined_call_operand.vmem [shape: f32[9], index: 0, kind: input, shape index: {}]   ;;  %s23_s1 = inlined_call_operand.vmem [shape: f32[2,9], index: 1, kind: output, shape index: {}]  }
   0x1   :  { %v4_v0 = vld [vmem:[%s22_s0] ss:$0 sm:$0xff] }
   0x2   :  { %5 = vst [vmem:[%s23_s1] sm:$0x3] %v4_v0 }

// kernel: tile.0
= control target key start
LH: loop header
LB: loop body
LE: loop exit
PB: predicated region body
PF: predicated region fallthrough
CT: control target
= control target key end

     0   :  { %s74_s8 = smov 127   ;;  %vm7_vm0 = vcmask 7168   ;;  %s75_s11 = smov 124   ;;  %s130_s0 = inlined_call_operand.vmem [shape: f32[2,9], index: 0, kind: input, shape index: {}]   ;;  %s131_s1 = inlined_call_operand.vmem [shape: f32[18,1], index: 1, kind: output, shape index: {}]  }
   0x1   :  { %v4_v0 = vld [vmem:[%s130_s0] sm:$0x3]  ;;  %s73_s0 = smov 125   ;;  %s76_s12 = smov 126  }
   0x2   :  { %5 = vst [vmem:[#allocation0] sm:$0x3] %v4_v0  ;;  %s77_s13 = smov 122   ;;  %s78_s14 = smov 123  }
   0x3   :  { %s79_s15 = smov 120   ;;  %s80_s16 = smov 121  }
   0x9   :  { %v21_v1 = vld [vmem:[#allocation0] sm:$0x3]  }
   0xa   :  { %v9_v2 = vld [vmem:[#allocation0] sm:$0x3]   ;;  %22 = vrot.lane.b32.xlu1 %v21_v1, %s73_s0 }
   0xb   :  { %10 = vrot.lane.b32.xlu0 %v9_v2, %s74_s8  ;;  %v27_v3 = vld [vmem:[#allocation0] sm:$0x3]  }
   0xc   :  { %v15_v4 = vld [vmem:[#allocation0] sm:$0x3]  }
   0xd   :  { %v6_v5 = vld [vmem:[#allocation0] sm:$0x3]  }
   0xe   :  { %8 = vst.msk [vmem:[%s131_s1] ss:$9 sm:$0x3] %vm7_vm0, %v6_v5   ;;  %28 = vrot.lane.b32.xlu1 %v27_v3, %s75_s11  ;;  %v39_v6 = vld [vmem:[#allocation0] sm:$0x3]  }
   0xf   :  { %16 = vrot.lane.b32.xlu0 %v15_v4, %s76_s12  ;;  %v33_v7 = vld [vmem:[#allocation0] sm:$0x3]  }
  0x10   :  { %v51_v8 = vld [vmem:[#allocation0] sm:$0x3]  }
  0x11   :  { %v45_v9 = vld [vmem:[#allocation0] sm:$0x3]  }
  0x12   :  { %40 = vrot.lane.b32.xlu1 %v39_v6, %s77_s13 }
  0x13   :  { %34 = vrot.lane.b32.xlu0 %v33_v7, %s78_s14 }
  0x16   :  { %52 = vrot.lane.b32.xlu1 %v51_v8, %s79_s15 }
  0x17   :  { %46 = vrot.lane.b32.xlu0 %v45_v9, %s80_s16 }
  0x7c   :  { %v23_v10 = vpop.permute.xlu1 %22  }
  0x7d   :  { %v11_v11 = vpop.permute.xlu0 %10   ;;  %59 = vst.msk [vmem:[%s131_s1 + $0x3] ss:$9 sm:$0x3] %vm7_vm0, %v23_v10  }
  0x7e   :  { %57 = vst.msk [vmem:[%s131_s1 + $0x1] ss:$9 sm:$0x3] %vm7_vm0, %v11_v11  }
  0x80   :  { %v29_v12 = vpop.permute.xlu1 %28  }
  0x81   :  { %v17_v13 = vpop.permute.xlu0 %16   ;;  %60 = vst.msk [vmem:[%s131_s1 + $0x4] ss:$9 sm:$0x3] %vm7_vm0, %v29_v12  }
  0x82   :  { %58 = vst.msk [vmem:[%s131_s1 + $0x2] ss:$9 sm:$0x3] %vm7_vm0, %v17_v13  }
  0x84   :  { %v41_v14 = vpop.permute.xlu1 %40  }
  0x85   :  { %v35_v15 = vpop.permute.xlu0 %34   ;;  %62 = vst.msk [vmem:[%s131_s1 + $0x6] ss:$9 sm:$0x3] %vm7_vm0, %v41_v14  }
  0x86   :  { %61 = vst.msk [vmem:[%s131_s1 + $0x5] ss:$9 sm:$0x3] %vm7_vm0, %v35_v15  }
  0x88   :  { %v53_v16 = vpop.permute.xlu1 %52  }
  0x89   :  { %v47_v17 = vpop.permute.xlu0 %46   ;;  %64 = vst.msk [vmem:[%s131_s1 + $0x8] ss:$9 sm:$0x3] %vm7_vm0, %v53_v16  }
  0x8a   :  { %63 = vst.msk [vmem:[%s131_s1 + $0x7] ss:$9 sm:$0x3] %vm7_vm0, %v47_v17  }

// kernel: forward.1
= control target key start
LH: loop header
LB: loop body
LE: loop exit
PB: predicated region body
PF: predicated region fallthrough
CT: control target
= control target key end

     0   :  { %vm59_vm0 = vcmask 1043456   ;;  %vm49_vm1 = vcmask 31744   ;;  %v2872_v0 = vmov 0.0   ;;  %vm2873_vm2 = vmmov 0   ;;  %s3337_s3 = inlined_call_operand.vmem [shape: f32[4,24], index: 3, kind: input, shape index: {}]   ;;  %s3338_s0 = inlined_call_operand.vmem [shape: f32[18,13], index: 0, kind: input, shape index: {}]   ;;  %s3339_s5 = inlined_call_operand.vmem [shape: f32[24,24], index: 5, kind: input, shape index: {}]   ;;  %s3340_s7 = inlined_call_operand.vmem [shape: f32[24,13], index: 7, kind: input, shape index: {}]   ;;  %s3341_s4 = inlined_call_operand.vmem [shape: f32[1,24], index: 4, kind: input, shape index: {}]   ;;  %s3342_s2 = inlined_call_operand.vmem [shape: f32[9,1], index: 2, kind: input, shape index: {}]   ;;  %s3343_s1 = inlined_call_operand.vmem [shape: f32[18,1], index: 1, kind: input, shape index: {}]   ;;  %s3344_s6 = inlined_call_operand.vmem [shape: f32[1,24], index: 6, kind: input, shape index: {}]   ;;  %s3345_s8 = inlined_call_operand.vmem [shape: f32[1,13], index: 8, kind: input, shape index: {}]   ;;  %s3346_s9 = inlined_call_operand.vmem [shape: f32[2,26,13], index: 9, kind: input, shape index: {}]   ;;  %s3347_s10 = inlined_call_operand.vmem [shape: f32[2,2,13,13], index: 10, kind: input, shape index: {}]   ;;  %s3348_s11 = inlined_call_operand.vmem [shape: f32[2,9,13], index: 11, kind: output, shape index: {}]  }
   0x1   :  { %2538 = vmatprep.subr.mxu0 %v2872_v0  ;;  %v41_v1 = vld [vmem:[%s3337_s3] sm:$0xf]  ;;  %2540 = vmatprep.mubr.msk.f32.mxu0 %vm2873_vm2, %v2872_v0  ;;  %v2874_v3 = vmov 0.0|0.0   ;;  %v2957_v4 = vld [vmem:[%s3338_s0 + $0x8] sm:$0xff]  ;;  %v2966_v5 = vld [vmem:[%s3338_s0 + $0x10] sm:$0x3] }
   0x2   :  { %v2946_v2 = vld [vmem:[%s3338_s0] sm:$0xff]  ;;  %2539 = vmatpush3.msk.msra.mxu0 %vm59_vm0, %v41_v1  ;;  %2731 = vmatprep.subr.bf16.mxu1 %v2874_v3  ;;  %v147_v7 = vld [vmem:[%s3339_s5 + $0x8] sm:$0xff]  ;;  %v148_v9 = vld [vmem:[%s3339_s5 + $0x10] sm:$0xff]  ;;  %vm156_vm3 = vcmask 195584   ;;  %v2875_v27 = vmov 0   ;;  %vm432_vm10 = vcmask 1040384  }
   0x3   :  { %2541 = vmatmul.mubr.msk.f32.vlgmr.msra.gmra.mrb[0].mxu0 %vm49_vm1, %v2946_v2  ;;  %2555 = vmatprep.mubr.msk.f32.mxu1 %vm2873_vm2, %v2872_v0  ;;  %v146_v6 = vld [vmem:[%s3339_s5] sm:$0xff]  ;;  %v250_v11 = vld [vmem:[%s3340_s7 + $0x8] sm:$0xff]  ;;  %v251_v26 = vld [vmem:[%s3340_s7 + $0x10] sm:$0xff]  ;;  %vm2876_vm11 = vmmov 1   ;;  %vm889_vm13 = vcmask 1046528   ;;  %vm425_vm14 = vcmask 72704  }
   0x4   :  { %2543 = vmatprep.mubr.msk.f32.mxu0 %vm2873_vm2, %v2872_v0  ;;  %2734 = vmatprep.subr.bf16.mxu0 %v2874_v3  ;;  %v2732_v8 = vpack.c.bf16 %v147_v7, %v146_v6  ;;  %v249_v10 = vld [vmem:[%s3340_s7] sm:$0xff]  ;;  %v349_v30 = vld [vmem:[%s3343_s1 + $0x8] sm:$0xff]  ;;  %v350_v31 = vld [vmem:[%s3343_s1 + $0x10] sm:$0x3]  ;;  %vm511_vm15 = vcmask 105472   ;;  %vm524_vm0 = vcmask 1044480  }
   0x5   :  { %v2735_v12 = vpack.c.bf16 %v250_v11, %v249_v10  ;;  %v2341_v13 = vld [vmem:[%s3341_s4] ss:$0 sm:$0xff]  ;;  %2871 = vset.pattern.permute.xlu1 %v2875_v27  ;;  %2870 = vset.pattern.permute.xlu0 %v2875_v27  ;;  %v376_v33 = vld [vmem:[%s3342_s2 + $0x8] sm:$0x1]  ;;  %vm352_vm5 = vcmp.gt.f32.partialorder %v349_v30, 0.5  ;;  %vm353_vm6 = vcmp.gt.f32.partialorder %v350_v31, 0.5  ;;  %vm3050_vm12 = vmpackc.low %vm432_vm10, %vm2876_vm11 }
   0x6   :  { %2733 = vmatpush3.bf16.msra.mxu1 %v2732_v8  ;;  %v375_v28 = vld [vmem:[%s3342_s2] sm:$0xff]  ;;  %v355_v34 = vsel %vm352_vm5, 1, %v2875_v27  ;;  %v356_v35 = vsel %vm353_vm6, 1, %v2875_v27  ;;  %v2363_v30 = vld [vmem:[%s3347_s10 + $0x18] sm:$0x1f]  ;;  %vm2335_vm5 = vcmask 99328  }
   0x7   :  { %2544 = vmatmul.mubr.msk.f32.gmra.mrb[2].mxu0 %vm49_vm1, %v2957_v4  ;;  %2553 = vmatprep.subr.mxu1 %v2872_v0  ;;  %v348_v29 = vld [vmem:[%s3343_s1] sm:$0xff] }
   0x8   :  { %2546 = vmatprep.mubr.msk.f32.mxu0 %vm2873_vm2, %v2872_v0  ;;  %2736 = vmatpush3.bf16.msra.mxu0 %v2735_v12  ;;  %vm351_vm4 = vcmp.gt.f32.partialorder %v348_v29, 0.5  ;;  %v2346_v36 = vld [vmem:[%s3344_s6] ss:$0 sm:$0xff]  ;;  %v2362_v29 = vld [vmem:[%s3347_s10 + $0x10] sm:$0xff] }
   0x9   :  { %2568 = vmatprep.subr.mxu0 %v2872_v0  ;;  %383 = vperm.xlu1 %2871, %v375_v28   ;;  %v354_v32 = vsel %vm351_vm4, 1, %v2875_v27  ;;  %v2350_v51 = vld [vmem:[%s3345_s8] ss:$0 sm:$0xff]  ;;  %v379_v27 = vld [vmem:[%s3346_s9 + $0x10] sm:$0xff]  ;;  %v380_v28 = vld [vmem:[%s3346_s9 + $0x18] sm:$0x3]  ;;  %v2749_v31 = vpack.c.bf16 %v2363_v30, %v2362_v29 }
   0xa   :  { %2554 = vmatpush3.msra.mxu1 %v148_v9  ;;  %358 = vperm.xlu0 %2870, %v354_v32   ;;  %v613_v32 = vld [vmem:[%s3347_s10] sm:$0xff]  ;;  %v2404_v29 = vld [vmem:[%s3347_s10 + $0x30] sm:$0xff]  ;;  %v2405_v30 = vld [vmem:[%s3347_s10 + $0x38] sm:$0x1f]  ;;  %vm2333_vm4 = vcmask 105473  }
   0xb   :  { %2547 = vmatmul.mubr.msk.f32.gmra.mrb[4].mxu0 %vm49_vm1, %v2966_v5  ;;  %vm3080_vm1 = vmpackc.low %vm524_vm0, %vm2876_vm11 }
   0xc   :  { %2570 = vmatprep.mubr.msk.f32.mxu0 %vm2873_vm2, %v2872_v0  ;;  %2569 = vmatpush3.msra.mxu0 %v251_v26  ;;  %v378_v26 = vld [vmem:[%s3346_s9 + $0x8] sm:$0xff] }
   0xd   :  { %388 = vperm.xlu1 %2871, %v376_v33   ;;  %2751 = vmatprep.subr.msk.bf16.mxu0 %vm3080_vm1, %v2749_v31  ;;  %v614_v33 = vld [vmem:[%s3347_s10 + $0x8] sm:$0x1f] }
   0xe   :  { %361 = vperm.xlu0 %2870, %v355_v34   ;;  %v3118_v34 = vpack.c.bf16 %v614_v33, %v613_v32  ;;  %v2402_v32 = vld [vmem:[%s3347_s10 + $0x20] sm:$0xff]  ;;  %v2403_v33 = vld [vmem:[%s3347_s10 + $0x28] sm:$0x1f] }
  0x11   :  { %364 = vperm.xlu1 %2871, %v356_v35  }
  0x88   :  { %v3027_v49 = vpop.permute.xlu1 %383 }
  0x89   :  { %v359_v50 = vpop.permute.xlu0 %358  ;;  %v3043_v6 = vrot.slane %v3027_v49, 7 }
  0x8a   :  { %vm366_vm7 = vcmp.eq.s32.totalorder %v359_v50, 1 }
  0x8c   :  { %v3032_v54 = vpop.permute.xlu1 %388 }
  0x8d   :  { %v362_v57 = vpop.permute.xlu0 %361 }
  0x8e   :  { %vm367_vm8 = vcmp.eq.s32.totalorder %v362_v57, 1 }
  0xd6   :  { %v129_v14 = vpop.f32.mrb[0].mxu0 }
  0xd7   :  { %v130_v15 = vadd.f32 %v2341_v13, %v129_v14  ;;  %v2542_v16 = vpop.f32.mrb[1].mxu0 }
  0xd9   :  { %v143_v17 = vmax.f32 %v130_v15, 0.0 }
  0xda   :  { %v134_v18 = vpop.f32.mrb[2].mxu0 }
  0xdb   :  { %v135_v19 = vadd.f32 %v2341_v13, %v134_v18  ;;  %v2545_v20 = vpop.f32.mrb[3].mxu0  ;;  %2556 = vmatmul.mubr.msk.f32.vlgmr.msra.gmra.mrb[0].mxu1 %vm156_vm3, %v143_v17 }
  0xdc   :  { %2558 = vmatprep.mubr.msk.f32.mxu1 %vm2873_vm2, %v2872_v0 }
  0xdd   :  { %v144_v21 = vmax.f32 %v135_v19, 0.0 }
  0xde   :  { %v139_v22 = vpop.f32.mrb[4].mxu0 }
  0xdf   :  { %v140_v23 = vadd.f32 %v2341_v13, %v139_v22  ;;  %2559 = vmatmul.mubr.msk.f32.gmra.mrb[2].mxu1 %vm156_vm3, %v144_v21  ;;  %v2548_v24 = vpop.f32.mrb[5].mxu0  ;;  %v3075_v21 = vld [vmem:[%s3346_s9] sm:$0xff] }
  0xe0   :  { %2561 = vmatprep.mubr.msk.f32.mxu1 %vm2873_vm2, %v2872_v0 }
  0xe1   :  { %v145_v25 = vmax.f32 %v140_v23, 0.0 }
  0xe3   :  { %2562 = vmatmul.mubr.msk.f32.gmra.mrb[4].mxu1 %vm156_vm3, %v145_v25 }
 0x1ae   :  { %v232_v37 = vpop.f32.mrb[0].mxu1 }
 0x1af   :  { %v233_v38 = vadd.f32 %v2346_v36, %v232_v37  ;;  %v2557_v39 = vpop.f32.mrb[1].mxu1 }
 0x1b1   :  { %v246_v40 = vmax.f32 %v233_v38, 0.0 }
 0x1b2   :  { %v237_v41 = vpop.f32.mrb[2].mxu1 }
 0x1b3   :  { %v238_v42 = vadd.f32 %v2346_v36, %v237_v41  ;;  %v2560_v43 = vpop.f32.mrb[3].mxu1  ;;  %2571 = vmatmul.mubr.msk.f32.vlgmr.msra.gmra.mrb[6].mxu0 %vm156_vm3, %v246_v40 }
 0x1b4   :  { %2573 = vmatprep.mubr.msk.f32.mxu0 %vm2873_vm2, %v2872_v0  ;;  %2754 = vmatpush3.bf16.msk.msra.mxu0 %vm3080_vm1, %v2749_v31 }
 0x1b5   :  { %v247_v44 = vmax.f32 %v238_v42, 0.0  ;;  %2757 = vmatprep.subr.msk.bf16.mxu0 %vm3080_vm1, %v3118_v34 }
 0x1b6   :  { %v242_v45 = vpop.f32.mrb[4].mxu1 }
 0x1b7   :  { %v243_v46 = vadd.f32 %v2346_v36, %v242_v45  ;;  %2574 = vmatmul.mubr.msk.f32.gmra.mrb[8].mxu0 %vm156_vm3, %v247_v44  ;;  %v2563_v47 = vpop.f32.mrb[5].mxu1 }
 0x1b8   :  { %2576 = vmatprep.mubr.msk.f32.mxu0 %vm2873_vm2, %v2872_v0  ;;  %v365_v0 = vpop.permute.xlu1 %364  ;;  %vm621_vm2 = vcmask 1042432  }
 0x1b9   :  { %v248_v48 = vmax.f32 %v243_v46, 0.0  ;;  %vm368_vm9 = vcmp.eq.s32.totalorder %v365_v0, 1 }
 0x1bb   :  { %2577 = vmatmul.mubr.msk.f32.gmra.mrb[10].mxu0 %vm156_vm3, %v248_v48  ;;  %vm2330_vm3 = vcmask 98304  }
 0x286   :  { %v334_v52 = vpop.f32.mrb[6].mxu0 }
 0x287   :  { %v335_v53 = vadd.f32 %v2350_v51, %v334_v52  ;;  %v2572_v55 = vpop.f32.mrb[7].mxu0 }
 0x289   :  { %v369_v56 = vsel %vm366_vm7, %v335_v53, 0.0 }
 0x28a   :  { %v3035_v58 = vadd.f32 %v369_v56, %v2946_v2  ;;  %v339_v59 = vpop.f32.mrb[8].mxu0  ;;  %v881_v2 = vrot.slane %v3032_v54, 7 }
 0x28b   :  { %v340_v60 = vadd.f32 %v2350_v51, %v339_v59  ;;  %v2575_v61 = vpop.f32.mrb[9].mxu0 }
 0x28c   :  { %v391_v62 = vmul.f32 %v3027_v49, %v3035_v58  ;;  %v3061_v14 = vsel %vm432_vm10, %v3043_v6, %v881_v2 }
 0x28d   :  { %v370_v63 = vsel %vm367_vm8, %v340_v60, 0.0 }
 0x28e   :  { %v3040_v1 = vadd.f32 %v370_v63, %v2957_v4  ;;  %393 = vxpose.xlu0.b32.start [1/2] (short) (narrow) %v391_v62, 16  ;;  %v344_v3 = vpop.f32.mrb[10].mxu0 }
 0x28f   :  { %v345_v7 = vadd.f32 %v2350_v51, %v344_v3  ;;  %v2578_v8 = vpop.f32.mrb[11].mxu0 }
 0x290   :  { %v392_v9 = vmul.f32 %v3032_v54, %v3040_v1  ;;  %v885_v13 = vmul.f32 %v3043_v6, %v3040_v1  ;;  %v1268_v57 = vrot.slane %v3040_v1, 1 }
 0x291   :  { %v371_v10 = vsel %vm368_vm9, %v345_v7, 0.0 }
 0x292   :  { %v2737_v11 = vpack.c.bf16 %v392_v9, %v391_v62  ;;  %v3055_v12 = vadd.f32 %v371_v10, %v2966_v5  ;;  %394 = vxpose.xlu0.b32.end [2/2] (short) (narrow) %v392_v9, 16  ;;  %v890_v16 = vrot.slane %v885_v13, 1 }
 0x294   :  { %2739 = vmatprep.subr.msk.bf16.mxu1 %vm3050_vm12, %v2737_v11  ;;  %v886_v15 = vmul.f32 %v3061_v14, %v3055_v12  ;;  %v1269_v56 = vrot.slane %v3055_v12, 1 }
 0x295   :  { %2742 = vmatpush3.bf16.msk.msra.mxu1 %vm3050_vm12, %v2737_v11 }
 0x296   :  { %v891_v5 = vrot.slane %v886_v15, 1  ;;  %v1270_v59 = vsel %vm889_vm13, %v1268_v57, %v1269_v56 }
 0x298   :  { %v892_v17 = vsel %vm889_vm13, %v890_v16, %v891_v5 }
 0x299   :  { %895 = vxpose.xlu1.b32.start [1/2] (short) (narrow) %v892_v17, 16  ;;  %v2767_v18 = vpack.c.bf16 %v891_v5, %v892_v17 }
 0x29d   :  { %896 = vxpose.xlu1.b32.end [2/2] (short) (narrow) %v891_v5, 16 }
 0x30e   :  { %v409_v19 = vpop.trf.xlu0 }
 0x30f   :  { %2583 = vmatprep.mubr.msk.f32.mxu1 %vm425_vm14, %v409_v19 }
 0x312   :  { %v410_v20 = vpop.trf.xlu0 }
 0x313   :  { %2584 = vmatmul.mubr.msk.f32.vlgmr.msra.gmra.mrb[6].mxu1 %vm425_vm14, %v410_v20 }
 0x314   :  { %2590 = vmatprep.mubr.msk.f32.mxu1 %vm511_vm15, %v3075_v21 }
 0x319   :  { %v911_v44 = vpop.trf.xlu1 }
 0x31d   :  { %v912_v45 = vpop.trf.xlu1 }
 0x3e6   :  { %v2585_v22 = vpop.f32.mrb[6].mxu1 }
 0x3e7   :  { %v502_v24 = vpop.f32.mrb[7].mxu1 }
 0x3e8   :  { %v2743_v25 = vpack.c.bf16 %v2585_v22, %v502_v24 }
 0x3ea   :  { %2745 = vmatprep.subr.msk.bf16.mxu1 %vm3080_vm1, %v2743_v25 }
 0x3eb   :  { %2748 = vmatpush3.bf16.msk.msra.mxu1 %vm3080_vm1, %v2743_v25 }
 0x3ee   :  { %2591 = vmatmul.mubr.msk.f32.vlgmr.msra.gmra.mrb[8].mxu1 %vm511_vm15, %v378_v26 }
 0x3ef   :  { %2593 = vmatprep.mubr.msk.f32.mxu1 %vm511_vm15, %v379_v27 }
 0x3f2   :  { %2594 = vmatmul.mubr.msk.f32.gmra.mrb[10].mxu1 %vm511_vm15, %v380_v28 }
 0x3f3   :  { %2614 = vmatprep.mubr.msk.f32.mxu1 %vm511_vm15, %v3035_v58 }
 0x4c1   :  { %v2592_v35 = vpop.f32.mrb[8].mxu1 }
 0x4c2   :  { %v594_v36 = vpop.f32.mrb[9].mxu1  ;;  %v622_v40 = vrot.slane %v2592_v35, 5 }
 0x4c5   :  { %v2595_v37 = vpop.f32.mrb[10].mxu1 }
 0x4c6   :  { %v625_v38 = vrot.slane %v2595_v37, 5  ;;  %v604_v39 = vpop.f32.mrb[11].mxu1 }
 0x4c7   :  { %v623_v41 = vrot.slane %v604_v39, 5 }
 0x4c9   :  { %v626_v42 = vsel %vm621_vm2, %v623_v41, %v625_v38  ;;  %v624_v43 = vsel %vm621_vm2, %v622_v40, %v623_v41 }
 0x4ca   :  { %2600 = vmatprep.mubr.msk.f32.mxu0 %vm511_vm15, %v624_v43 }
 0x4cb   :  { %2601 = vmatmul.mubr.msk.f32.vlgmr.msra.gmra.mrb[12].mxu0 %vm511_vm15, %v626_v42 }
 0x4cc   :  { %2760 = vmatpush3.bf16.msk.msra.mxu0 %vm3080_vm1, %v3118_v34  ;;  %2607 = vmatprep.mubr.msk.f32.mxu0 %vm511_vm15, %v594_v36 }
 0x4cd   :  { %2769 = vmatprep.subr.msk.bf16.mxu0 %vm3050_vm12, %v2767_v18 }
 0x4d3   :  { %2608 = vmatmul.mubr.msk.f32.vlgmr.msra.gmra.mrb[12].mxu0 %vm511_vm15, %v2592_v35 }
 0x4d4   :  { %2772 = vmatpush3.bf16.msk.msra.mxu0 %vm3050_vm12, %v2767_v18  ;;  %2621 = vmatprep.mubr.msk.f32.mxu0 %vm425_vm14, %v911_v44 }
 0x4d5   :  { %2781 = vmatprep.subr.msk.bf16.mxu0 %vm3080_vm1, %v2749_v31 }
 0x4d7   :  { %2622 = vmatmul.mubr.msk.f32.vlgmr.msra.gmra.mrb[14].mxu0 %vm425_vm14, %v912_v45 }
 0x4d8   :  { %2784 = vmatpush3.bf16.msk.msra.mxu0 %vm3080_vm1, %v2749_v31  ;;  %v2809_v31 = vpack.c.bf16 %v2405_v30, %v2404_v29 }
 0x4d9   :  { %2787 = vmatprep.subr.msk.bf16.mxu0 %vm3080_vm1, %v3118_v34 }
 0x5a6   :  { %v2609_v46 = vpop.f32.mrb[12].mxu0 }
 0x5a7   :  { %v793_v47 = vmul.f32 0.125, %v2609_v46  ;;  %v783_v48 = vpop.f32.mrb[13].mxu0 }
 0x5a8   :  { %v792_v50 = vmul.f32 0.125, %v783_v48 }
 0x5aa   :  { %v2761_v51 = vpack.c.bf16 %v793_v47, %v792_v50  ;;  %v2623_v52 = vpop.f32.mrb[14].mxu0 }
 0x5ab   :  { %v1001_v53 = vpop.f32.mrb[15].mxu0 }
 0x5ac   :  { %2763 = vmatprep.subr.msk.bf16.mxu1 %vm3080_vm1, %v2761_v51  ;;  %v2773_v55 = vpack.c.bf16 %v2623_v52, %v1001_v53 }
 0x5ad   :  { %2766 = vmatpush3.bf16.msk.msra.mxu1 %vm3080_vm1, %v2761_v51 }
 0x5ae   :  { %2775 = vmatprep.subr.msk.bf16.mxu1 %vm3080_vm1, %v2773_v55 }
 0x5b0   :  { %2615 = vmatmul.mubr.msk.f32.vlgmr.msra.gmra.mrb[12].mxu1 %vm511_vm15, %v3040_v1 }
 0x5b1   :  { %2778 = vmatpush3.bf16.msk.msra.mxu1 %vm3080_vm1, %v2773_v55  ;;  %2628 = vmatprep.mubr.msk.f32.mxu1 %vm511_vm15, %v3075_v21  ;;  %v3196_v21 = vld [vmem:[%s3346_s9 + $0x20] sm:$0xff] }
 0x5b4   :  { %2629 = vmatmul.mubr.msk.f32.vlgmr.msra.gmra.mrb[14].mxu1 %vm511_vm15, %v378_v26  ;;  %v3208_v26 = vld [vmem:[%s3346_s9 + $0x28] sm:$0xff] }
 0x5b5   :  { %2631 = vmatprep.mubr.msk.f32.mxu1 %vm511_vm15, %v379_v27  ;;  %v3213_v27 = vld [vmem:[%s3346_s9 + $0x30] sm:$0xff] }
 0x5b8   :  { %2632 = vmatmul.mubr.msk.f32.gmra.mrb[16].mxu1 %vm511_vm15, %v380_v28  ;;  %v3222_v28 = vld [vmem:[%s3346_s9 + $0x38] sm:$0x3] }
 0x5b9   :  { %2652 = vmatprep.mubr.msk.f32.mxu1 %vm511_vm15, %v1270_v59 }
 0x683   :  { %v2616_v60 = vpop.f32.mrb[12].mxu1 }
 0x684   :  { %v869_v61 = vpop.f32.mrb[13].mxu1  ;;  %v3168_v63 = vadd.f32 %v2616_v60, %v3040_v1 }
 0x685   :  { %v3165_v62 = vadd.f32 %v869_v61, %v3035_v58 }
 0x686   :  { %v1368_v7 = vmul.f32 %v3168_v63, %v3032_v54 }
 0x687   :  { %v2630_v0 = vpop.f32.mrb[14].mxu1  ;;  %v1367_v3 = vmul.f32 %v3165_v62, %v3027_v49 }
 0x688   :  { %v1079_v2 = vpop.f32.mrb[15].mxu1  ;;  %v1101_v11 = vrot.slane %v2630_v0, 5 }
 0x689   :  { %1369 = vxpose.xlu0.b32.start [1/2] (short) (narrow) %v1367_v3, 16  ;;  %v2797_v16 = vpack.c.bf16 %v1368_v7, %v1367_v3 }
 0x68b   :  { %v2633_v8 = vpop.f32.mrb[16].mxu1 }
 0x68c   :  { %v1104_v9 = vrot.slane %v2633_v8, 5  ;;  %v1089_v10 = vpop.f32.mrb[17].mxu1 }
 0x68d   :  { %v1102_v13 = vrot.slane %v1089_v10, 5  ;;  %1370 = vxpose.xlu0.b32.end [2/2] (short) (narrow) %v1368_v7, 16 }
 0x68f   :  { %v1105_v58 = vsel %vm621_vm2, %v1102_v13, %v1104_v9  ;;  %v1103_v15 = vsel %vm621_vm2, %v1101_v11, %v1102_v13 }
 0x690   :  { %2638 = vmatprep.mubr.msk.f32.mxu0 %vm511_vm15, %v1103_v15 }
 0x691   :  { %2639 = vmatmul.mubr.msk.f32.vlgmr.msra.gmra.mrb[16].mxu0 %vm511_vm15, %v1105_v58 }
 0x692   :  { %2790 = vmatpush3.bf16.msk.msra.mxu0 %vm3080_vm1, %v3118_v34  ;;  %2645 = vmatprep.mubr.msk.f32.mxu0 %vm511_vm15, %v1079_v2  ;;  %v3244_v34 = vpack.c.bf16 %v2403_v33, %v2402_v32 }
 0x693   :  { %2799 = vmatprep.subr.msk.bf16.mxu0 %vm3050_vm12, %v2797_v16 }
 0x699   :  { %2646 = vmatmul.mubr.msk.f32.vlgmr.msra.gmra.mrb[16].mxu0 %vm511_vm15, %v2630_v0 }
 0x69a   :  { %2802 = vmatpush3.bf16.msk.msra.mxu0 %vm3050_vm12, %v2797_v16 }
 0x69b   :  { %2811 = vmatprep.subr.msk.bf16.mxu0 %vm3080_vm1, %v2809_v31 }
 0x709   :  { %v1385_v49 = vpop.trf.xlu0 }
 0x70a   :  { %2659 = vmatprep.mubr.msk.f32.mxu0 %vm425_vm14, %v1385_v49 }
 0x70d   :  { %v1386_v54 = vpop.trf.xlu0 }
 0x70e   :  { %2660 = vmatmul.mubr.msk.f32.vlgmr.msra.gmra.mrb[18].mxu0 %vm425_vm14, %v1386_v54 }
 0x70f   :  { %2814 = vmatpush3.bf16.msk.msra.mxu0 %vm3080_vm1, %v2809_v31 }
 0x710   :  { %2817 = vmatprep.subr.msk.bf16.mxu0 %vm3080_vm1, %v3244_v34 }
 0x76c   :  { %v2647_v5 = vpop.f32.mrb[16].mxu0 }
 0x76d   :  { %v1266_v17 = vmul.f32 0.125, %v2647_v5  ;;  %v1256_v18 = vpop.f32.mrb[17].mxu0 }
 0x76e   :  { %v1265_v19 = vmul.f32 0.125, %v1256_v18 }
 0x770   :  { %v2791_v20 = vpack.c.bf16 %v1266_v17, %v1265_v19 }
 0x772   :  { %2793 = vmatprep.subr.msk.bf16.mxu1 %vm3080_vm1, %v2791_v20 }
 0x773   :  { %2796 = vmatpush3.bf16.msk.msra.mxu1 %vm3080_vm1, %v2791_v20 }
 0x776   :  { %2653 = vmatmul.mubr.msk.f32.vlgmr.msra.gmra.mrb[18].mxu1 %vm511_vm15, %v1269_v56 }
 0x777   :  { %2666 = vmatprep.mubr.msk.f32.mxu1 %vm511_vm15, %v3196_v21 }
 0x7e1   :  { %v2661_v22 = vpop.f32.mrb[18].mxu0 }
 0x7e2   :  { %v1476_v24 = vpop.f32.mrb[19].mxu0 }
 0x7e3   :  { %v2803_v25 = vpack.c.bf16 %v2661_v22, %v1476_v24 }
 0x7e5   :  { %2805 = vmatprep.subr.msk.bf16.mxu1 %vm3080_vm1, %v2803_v25 }
 0x7e6   :  { %2808 = vmatpush3.bf16.msk.msra.mxu1 %vm3080_vm1, %v2803_v25 }
 0x7e9   :  { %2667 = vmatmul.mubr.msk.f32.vlgmr.msra.gmra.mrb[20].mxu1 %vm511_vm15, %v3208_v26 }
 0x7ea   :  { %2669 = vmatprep.mubr.msk.f32.mxu1 %vm511_vm15, %v3213_v27 }
 0x7ed   :  { %2670 = vmatmul.mubr.msk.f32.gmra.mrb[22].mxu1 %vm511_vm15, %v3222_v28 }
 0x7ee   :  { %2690 = vmatprep.mubr.msk.f32.mxu1 %vm511_vm15, %v3165_v62 }
 0x849   :  { %v2654_v35 = vpop.f32.mrb[18].mxu1 }
 0x84a   :  { %v1356_v36 = vrot.slane %v2654_v35, 7  ;;  %v1344_v37 = vpop.f32.mrb[19].mxu1 }
 0x84b   :  { %v1355_v38 = vrot.slane %v1344_v37, 7 }
 0x84d   :  { %v1357_v39 = vsel %vm432_vm10, %v1355_v38, %v1356_v36  ;;  %v3251_v40 = vadd.f32 %v1355_v38, %v3040_v1 }
 0x84e   :  { %v3254_v41 = vadd.f32 %v1357_v39, %v3055_v12 }
 0x84f   :  { %v1852_v42 = vmul.f32 %v3251_v40, %v3043_v6  ;;  %v2235_v7 = vrot.slane %v3251_v40, 1 }
 0x850   :  { %v1853_v43 = vmul.f32 %v3254_v41, %v3061_v14  ;;  %v2236_v8 = vrot.slane %v3254_v41, 1 }
 0x851   :  { %v1856_v44 = vrot.slane %v1852_v42, 1 }
 0x852   :  { %v1857_v45 = vrot.slane %v1853_v43, 1  ;;  %v2237_v9 = vsel %vm889_vm13, %v2235_v7, %v2236_v8 }
 0x854   :  { %v1858_v46 = vsel %vm889_vm13, %v1856_v44, %v1857_v45 }
 0x855   :  { %v2827_v47 = vpack.c.bf16 %v1857_v45, %v1858_v46  ;;  %1861 = vxpose.xlu0.b32.start [1/2] (short) (narrow) %v1858_v46, 16 }
 0x859   :  { %1862 = vxpose.xlu0.b32.end [2/2] (short) (narrow) %v1857_v45, 16 }
 0x8bc   :  { %v2668_v48 = vpop.f32.mrb[20].mxu1 }
 0x8bd   :  { %v1566_v50 = vpop.f32.mrb[21].mxu1  ;;  %v1594_v1 = vrot.slane %v2668_v48, 5 }
 0x8c0   :  { %v2671_v51 = vpop.f32.mrb[22].mxu1 }
 0x8c1   :  { %v1597_v52 = vrot.slane %v2671_v51, 5  ;;  %v1576_v12 = vpop.f32.mrb[23].mxu1 }
 0x8c2   :  { %v1595_v53 = vrot.slane %v1576_v12, 5 }
 0x8c4   :  { %v1598_v55 = vsel %vm621_vm2, %v1595_v53, %v1597_v52  ;;  %v1596_v6 = vsel %vm621_vm2, %v1594_v1, %v1595_v53 }
 0x8c5   :  { %2676 = vmatprep.mubr.msk.f32.mxu0 %vm511_vm15, %v1596_v6 }
 0x8c6   :  { %2677 = vmatmul.mubr.msk.f32.vlgmr.msra.gmra.mrb[20].mxu0 %vm511_vm15, %v1598_v55 }
 0x8c7   :  { %2820 = vmatpush3.bf16.msk.msra.mxu0 %vm3080_vm1, %v3244_v34  ;;  %2683 = vmatprep.mubr.msk.f32.mxu0 %vm511_vm15, %v1566_v50 }
 0x8c8   :  { %2829 = vmatprep.subr.msk.bf16.mxu0 %vm3050_vm12, %v2827_v47 }
 0x8ce   :  { %2684 = vmatmul.mubr.msk.f32.vlgmr.msra.gmra.mrb[20].mxu0 %vm511_vm15, %v2668_v48 }
 0x8cf   :  { %2832 = vmatpush3.bf16.msk.msra.mxu0 %vm3050_vm12, %v2827_v47 }
 0x8d0   :  { %2841 = vmatprep.subr.msk.bf16.mxu0 %vm3080_vm1, %v2809_v31 }
 0x8d5   :  { %v1877_v14 = vpop.trf.xlu0 }
 0x8d6   :  { %2697 = vmatprep.mubr.msk.f32.mxu0 %vm425_vm14, %v1877_v14 }
 0x8d9   :  { %v1878_v56 = vpop.trf.xlu0 }
 0x8da   :  { %2698 = vmatmul.mubr.msk.f32.vlgmr.msra.gmra.mrb[22].mxu0 %vm425_vm14, %v1878_v56 }
 0x8db   :  { %2844 = vmatpush3.bf16.msk.msra.mxu0 %vm3080_vm1, %v2809_v31 }
 0x8dc   :  { %2847 = vmatprep.subr.msk.bf16.mxu0 %vm3080_vm1, %v3244_v34 }
 0x9a1   :  { %v2685_v57 = vpop.f32.mrb[20].mxu0 }
 0x9a2   :  { %v1765_v59 = vmul.f32 0.125, %v2685_v57  ;;  %v1755_v4 = vpop.f32.mrb[21].mxu0 }
 0x9a3   :  { %v1764_v60 = vmul.f32 0.125, %v1755_v4 }
 0x9a5   :  { %v2821_v61 = vpack.c.bf16 %v1765_v59, %v1764_v60 }
 0x9a7   :  { %2823 = vmatprep.subr.msk.bf16.mxu1 %vm3080_vm1, %v2821_v61 }
 0x9a8   :  { %2826 = vmatpush3.bf16.msk.msra.mxu1 %vm3080_vm1, %v2821_v61 }
 0x9ab   :  { %2691 = vmatmul.mubr.msk.f32.vlgmr.msra.gmra.mrb[24].mxu1 %vm511_vm15, %v3168_v63 }
 0x9ac   :  { %2704 = vmatprep.mubr.msk.f32.mxu1 %vm511_vm15, %v3196_v21 }
 0x9ad   :  { %v2699_v0 = vpop.f32.mrb[22].mxu0 }
 0x9ae   :  { %v1967_v3 = vpop.f32.mrb[23].mxu0 }
 0x9af   :  { %v2833_v2 = vpack.c.bf16 %v2699_v0, %v1967_v3 }
 0x9b1   :  { %2835 = vmatprep.subr.msk.bf16.mxu1 %vm3080_vm1, %v2833_v2 }
 0x9b2   :  { %2838 = vmatpush3.bf16.msk.msra.mxu1 %vm3080_vm1, %v2833_v2 }
 0x9b5   :  { %2705 = vmatmul.mubr.msk.f32.vlgmr.msra.gmra.mrb[26].mxu1 %vm511_vm15, %v3208_v26 }
 0x9b6   :  { %2707 = vmatprep.mubr.msk.f32.mxu1 %vm511_vm15, %v3213_v27 }
 0x9b9   :  { %2708 = vmatmul.mubr.msk.f32.gmra.mrb[28].mxu1 %vm511_vm15, %v3222_v28 }
 0x9ba   :  { %2728 = vmatprep.mubr.msk.f32.mxu1 %vm511_vm15, %v2237_v9 }
 0xa7e   :  { %v2692_v10 = vpop.f32.mrb[24].mxu1 }
 0xa7f   :  { %v1851_v11 = vadd.f32 %v2692_v10, %v3168_v63  ;;  %v1841_v13 = vpop.f32.mrb[25].mxu1 }
 0xa80   :  { %v1850_v58 = vadd.f32 %v1841_v13, %v3165_v62 }
 0xa81   :  { %2331 = vst.msk [vmem:[%s3348_s11 + $0x8] sm:$0x1] %vm2330_vm3, %v1851_v11 }
 0xa82   :  { %2329 = vst.msk [vmem:[%s3348_s11] sm:$0xff] %vm511_vm15, %v1850_v58 }
 0xa88   :  { %v2706_v15 = vpop.f32.mrb[26].mxu1 }
 0xa89   :  { %v2045_v16 = vpop.f32.mrb[27].mxu1  ;;  %v2067_v17 = vrot.slane %v2706_v15, 5 }
 0xa8c   :  { %v2709_v49 = vpop.f32.mrb[28].mxu1 }
 0xa8d   :  { %v2070_v54 = vrot.slane %v2709_v49, 5  ;;  %v2055_v5 = vpop.f32.mrb[29].mxu1 }
 0xa8e   :  { %v2068_v18 = vrot.slane %v2055_v5, 5 }
 0xa90   :  { %v2071_v63 = vsel %vm621_vm2, %v2068_v18, %v2070_v54  ;;  %v2069_v62 = vsel %vm621_vm2, %v2067_v17, %v2068_v18 }
 0xa91   :  { %2714 = vmatprep.mubr.msk.f32.mxu0 %vm511_vm15, %v2069_v62 }
 0xa92   :  { %2715 = vmatmul.mubr.msk.f32.vlgmr.msra.gmra.mrb[24].mxu0 %vm511_vm15, %v2071_v63 }
 0xa93   :  { %2721 = vmatprep.mubr.msk.f32.mxu0 %vm511_vm15, %v2045_v16  ;;  %2850 = vmatpush3.bf16.msk.msra.mxu0 %vm3080_vm1, %v3244_v34 }
 0xa9a   :  { %2722 = vmatmul.mubr.msk.f32.vlgmr.msra.gmra.mrb[24].mxu0 %vm511_vm15, %v2706_v15 }
 0xb6d   :  { %v2723_v19 = vpop.f32.mrb[24].mxu0 }
 0xb6e   :  { %v2232_v20 = vmul.f32 0.125, %v2723_v19  ;;  %v2222_v21 = vpop.f32.mrb[25].mxu0 }
 0xb6f   :  { %v2231_v22 = vmul.f32 0.125, %v2222_v21 }
 0xb71   :  { %v2851_v24 = vpack.c.bf16 %v2232_v20, %v2231_v22 }
 0xb73   :  { %2853 = vmatprep.subr.msk.bf16.mxu1 %vm3080_vm1, %v2851_v24 }
 0xb74   :  { %2856 = vmatpush3.bf16.msk.msra.mxu1 %vm3080_vm1, %v2851_v24 }
 0xb77   :  { %2729 = vmatmul.mubr.msk.f32.vlgmr.msra.gmra.mrb[30].mxu1 %vm511_vm15, %v2236_v8 }
 0xc4a   :  { %v2730_v25 = vpop.f32.mrb[30].mxu1 }
 0xc4b   :  { %v2323_v26 = vrot.slane %v2730_v25, 7  ;;  %v2311_v27 = vpop.f32.mrb[31].mxu1 }
 0xc4c   :  { %v2322_v28 = vrot.slane %v2311_v27, 7 }
 0xc4e   :  { %v2324_v29 = vsel %vm432_vm10, %v2322_v28, %v2323_v26  ;;  %v2327_v30 = vadd.f32 %v2322_v28, %v3251_v40 }
 0xc4f   :  { %v2328_v31 = vadd.f32 %v2324_v29, %v3254_v41 }
 0xc50   :  { %2432 = vst.msk [vmem:[%s3348_s11 + $0xf] sm:$0xfe] %vm2333_vm4, %v2327_v30 }
 0xc51   :  { %2433 = vst.msk [vmem:[%s3348_s11 + $0x17] sm:$0x3] %vm2335_vm5, %v2328_v31 }

</bundles_post_ra>
